<compile_context>
chip_gen: v6e
topology: v6e:2x2x1
jax: 0.10.0
libtpu: 0.0.40
codegen_flags: <defaults>
</compile_context>

<pallas_src>
import jax
import jax.numpy as jnp
from jax import lax
from jax.experimental import pallas as pl
from jax.experimental.pallas import tpu as pltpu


def _round_up(x, m):
    return ((x + m - 1) // m) * m


def _cdiv(a, b):
    return (a + b - 1) // b


# --------------------------------------------------------------------------- #
# Kernel
# --------------------------------------------------------------------------- #
def _disc_kernel(x_ref, w1_ref, b1_ref, w2_ref, b2_ref, w3t_ref, b3_ref, o_ref):
    # Layer 1: (TB, IN) @ (IN, Hp) -> f32 accumulation, bias + ReLU in f32.
    h1 = jnp.dot(x_ref[...], w1_ref[...], preferred_element_type=jnp.float32)
    h1 = jnp.maximum(h1 + b1_ref[...], 0.0)                       # (TB, Hp) f32

    # Layer 2: cast activation to the weight compute dtype for the MXU.
    h2 = jnp.dot(h1.astype(w2_ref.dtype), w2_ref[...],
                 preferred_element_type=jnp.float32)
    h2 = jnp.maximum(h2 + b2_ref[...], 0.0)                       # (TB, Hp) f32

    # Layer 3, transposed & lane-dense, without materializing h2.T:
    #   contract (8, Hp) with (TB, Hp) on the Hp axis -> (8, TB);
    #   only row 0 is meaningful (rows 1..7 are zero padding of W3^T).
    zt = lax.dot_general(w3t_ref[...], h2,
                         dimension_numbers=(((1,), (1,)), ((), ())),
                         preferred_element_type=jnp.float32)      # (8, TB)
    z = zt[0:1, :] + b3_ref[0]                                    # (1, TB)

    # Sigmoid: exp on the EUP + reciprocal (exact) instead of a VPU divide.
    sig = pl.reciprocal(1.0 + jnp.exp(-z), approx=False)
    o_ref[...] = sig[None]                                        # (1, 1, TB)


# --------------------------------------------------------------------------- #
# One-time parameter packing (hoisted out of the per-call path)
# --------------------------------------------------------------------------- #
def pack_params(params, state_dim, action_dim, *, compute_dtype=jnp.bfloat16):
    """Pad / transpose / cast the Linear weights once.

    Returns (w1p, b1p, w2p, b2p, w3t, b3r):
      w1p : (S+A, Hp)  compute_dtype   (hidden dim zero-padded to 128 multiple)
      b1p : (1, Hp)    float32
      w2p : (Hp, Hp)   compute_dtype
      b2p : (1, Hp)    float32
      w3t : (8, Hp)    float32         (row 0 = W3^T, rows 1..7 zero)
      b3r : (1,)       float32         (SMEM scalar)
    """
    w1, b1, w2, b2, w3, b3 = params
    in_dim = state_dim + action_dim
    H = w1.shape[1]
    assert w1.shape[0] == in_dim and w2.shape == (H, H) and w3.shape == (H, 1)

    f32 = jnp.float32
    Hp = max(128, _round_up(H, 128))

    w1p = jnp.zeros((in_dim, Hp), f32).at[:, :H].set(w1.astype(f32))
    w2p = jnp.zeros((Hp, Hp), f32).at[:H, :H].set(w2.astype(f32))
    b1p = jnp.zeros((1, Hp), f32).at[0, :H].set(b1.astype(f32))
    b2p = jnp.zeros((1, Hp), f32).at[0, :H].set(b2.astype(f32))
    w3t = jnp.zeros((8, Hp), f32).at[0, :H].set(w3[:, 0].astype(f32))
    b3r = b3.reshape(1).astype(f32)

    return (w1p.astype(compute_dtype), b1p, w2p.astype(compute_dtype),
            b2p, w3t, b3r)


# --------------------------------------------------------------------------- #
# Forward wrapper
# --------------------------------------------------------------------------- #
def discriminator_forward(state, action, packed, *, batch_tile=None):
    """Pallas implementation of Discriminator.forward(state, action) -> (B, 1)."""
    w1p, b1p, w2p, b2p, w3t, b3r = packed
    IN, Hp = w1p.shape
    compute_dtype = w1p.dtype

    B, S = state.shape
    A = action.shape[1]
    assert S + A == IN

    # Batch tile: lane-dense (multiple of 128); single step for small B,
    # >= 2 parallel steps for large B (v7x megacore), capped at 1024.
    if batch_tile is None:
        if B <= 128:
            batch_tile = 128
        else:
            batch_tile = min(1024, _round_up(_cdiv(B, 2), 128))
    batch_tile = _round_up(batch_tile, 128)
    Bp = _round_up(B, batch_tile)
    n_tiles = Bp // batch_tile

    # Fused input prep on the activations only (B*(S+A) bytes — negligible).
    x = jnp.concatenate([state.astype(compute_dtype),
                         action.astype(compute_dtype)], axis=1)
    if Bp != B:
        x = jnp.pad(x, ((0, Bp - B), (0, 0)))

    # Advisory cost hint so XLA can overlap this short call with neighbors.
    itemsize = jnp.dtype(compute_dtype).itemsize
    cost = pl.CostEstimate(
        flops=2 * Bp * (IN * Hp + Hp * Hp + Hp),
        transcendentals=Bp,
        bytes_accessed=(Bp * IN * itemsize                # x
                        + (IN * Hp + Hp * Hp) * itemsize  # W1, W2
                        + (2 * Hp + 8 * Hp + 1) * 4       # b1, b2, W3^T, b3
                        + Bp * 4),                        # output
    )

    out3 = pl.pallas_call(
        _disc_kernel,
        out_shape=jax.ShapeDtypeStruct((n_tiles, 1, batch_tile), jnp.float32),
        grid_spec=pltpu.PrefetchScalarGridSpec(
            num_scalar_prefetch=0,
            grid=(n_tiles,),
            in_specs=[
                pl.BlockSpec((batch_tile, IN), lambda i: (i, 0)),   # x tile
                pl.BlockSpec((IN, Hp), lambda i: (0, 0)),           # W1
                pl.BlockSpec((1, Hp), lambda i: (0, 0)),            # b1
                pl.BlockSpec((Hp, Hp), lambda i: (0, 0)),           # W2
                pl.BlockSpec((1, Hp), lambda i: (0, 0)),            # b2
                pl.BlockSpec((8, Hp), lambda i: (0, 0)),            # W3^T (row 0)
                pl.BlockSpec(memory_space=pltpu.MemorySpace.SMEM),  # b3 scalar
            ],
            out_specs=pl.BlockSpec((1, 1, batch_tile), lambda i: (i, 0, 0)),
        ),
        compiler_params=pltpu.CompilerParams(
            dimension_semantics=("parallel",),
        ),
        cost_estimate=cost,
    )(x, w1p, b1p, w2p, b2p, w3t, b3r)

    # (n_tiles, 1, TB) -> (B, 1); padded batch rows are discarded here.
    return out3.reshape(-1)[:B].reshape(B, 1)


# --------------------------------------------------------------------------- #
# Parameter init + pure-JAX reference
# --------------------------------------------------------------------------- #
def init_params(key, state_dim, action_dim, hidden_dim):
    """nn.Linear-style U(-1/sqrt(fan_in), 1/sqrt(fan_in)); weights stored (in, out)."""
    in_dim = state_dim + action_dim
    ks = jax.random.split(key, 6)

    def lin(kw, kb, fan_in, fan_out):
        bound = 1.0 / jnp.sqrt(jnp.float32(fan_in))
        w = jax.random.uniform(kw, (fan_in, fan_out), jnp.float32, -bound, bound)
        b = jax.random.uniform(kb, (fan_out,), jnp.float32, -bound, bound)
        return w, b

    w1, b1 = lin(ks[0], ks[1], in_dim, hidden_dim)
    w2, b2 = lin(ks[2], ks[3], hidden_dim, hidden_dim)
    w3, b3 = lin(ks[4], ks[5], hidden_dim, 1)
    return (w1, b1, w2, b2, w3, b3)


def _reference_forward(state, action, params):
    w1, b1, w2, b2, w3, b3 = params
    x = jnp.concatenate([state, action], axis=1)
    h1 = jax.nn.relu(x @ w1 + b1)
    h2 = jax.nn.relu(h1 @ w2 + b2)
    return jax.nn.sigmoid(h2 @ w3 + b3)


if __name__ == "__main__":
    key = jax.random.PRNGKey(0)
    k_state, k_action, k_params = jax.random.split(key, 3)

    # Small shapes consistent with the module defaults: hidden_dim=256.
    B, STATE_DIM, ACTION_DIM, HIDDEN = 16, 6, 2, 256

    state = jax.random.normal(k_state, (B, STATE_DIM), jnp.float32)
    action = jax.random.normal(k_action, (B, ACTION_DIM), jnp.float32)
    params = init_params(k_params, STATE_DIM, ACTION_DIM, HIDDEN)
    ref = _reference_forward(state, action, params)

    # (a) float32 compute path — bit-exact check against the reference.
    packed_f32 = pack_params(params, STATE_DIM, ACTION_DIM,
                             compute_dtype=jnp.float32)
    out_f32 = jax.block_until_ready(
        discriminator_forward(state, action, packed_f32))
    assert out_f32.shape == (B, 1)
    err_f32 = float(jnp.max(jnp.abs(out_f32 - ref)))
    assert jnp.allclose(out_f32, ref, atol=2e-5, rtol=2e-5), \
        f"f32 max abs err {err_f32}"

    # (b) default bfloat16 compute path (MXU-native) — looser tolerance.
    packed_bf16 = pack_params(params, STATE_DIM, ACTION_DIM)
    out_bf16 = jax.block_until_ready(
        discriminator_forward(state, action, packed_bf16))
    assert out_bf16.shape == (B, 1)
    err_bf16 = float(jnp.max(jnp.abs(out_bf16 - ref)))
    assert jnp.allclose(out_bf16, ref, atol=2e-2, rtol=2e-2), \
        f"bf16 max abs err {err_bf16}"

    print("KERNEL_OK")
</pallas_src>

<mosaic_0001>
module attributes {stable_mosaic.version = 11 : i64} {
  func.func @_disc_kernel(%arg0: i32, %arg1: memref<128x8xf32, #tpu.memory_space<vmem>>, %arg2: memref<8x256xf32, #tpu.memory_space<vmem>>, %arg3: memref<1x256xf32, #tpu.memory_space<vmem>>, %arg4: memref<256x256xf32, #tpu.memory_space<vmem>>, %arg5: memref<1x256xf32, #tpu.memory_space<vmem>>, %arg6: memref<8x256xf32, #tpu.memory_space<vmem>>, %arg7: memref<1xf32, #tpu.memory_space<smem>>, %arg8: memref<1x1x128xf32, #tpu.memory_space<vmem>>) attributes {dimension_semantics = [#tpu.dimension_semantics<parallel>], iteration_bounds = array<i64: 1>, scalar_prefetch = 0 : i64, scratch_operands = 0 : i64, tpu.core_type = #tpu.core_type<tc>, window_params = [{transform_indices = @transform_0, window_bounds = array<i64: 128, 8>}, {pipeline_mode = #tpu.pipeline_mode<synchronous>, transform_indices = @transform_1, window_bounds = array<i64: 8, 256>}, {pipeline_mode = #tpu.pipeline_mode<synchronous>, transform_indices = @transform_2, window_bounds = array<i64: 1, 256>}, {pipeline_mode = #tpu.pipeline_mode<synchronous>, transform_indices = @transform_3, window_bounds = array<i64: 256, 256>}, {pipeline_mode = #tpu.pipeline_mode<synchronous>, transform_indices = @transform_4, window_bounds = array<i64: 1, 256>}, {pipeline_mode = #tpu.pipeline_mode<synchronous>, transform_indices = @transform_5, window_bounds = array<i64: 8, 256>}, {transform_indices = @transform_6, window_bounds = array<i64: 1>}, {transform_indices = @transform_7, window_bounds = array<i64: 1, 1, 128>}]} {
    %c0 = arith.constant 0 : index
    %c0_0 = arith.constant 0 : index
    %0 = vector.load %arg1[%c0, %c0_0] : memref<128x8xf32, #tpu.memory_space<vmem>>, vector<128x8xf32>
    %c0_1 = arith.constant 0 : index
    %c0_2 = arith.constant 0 : index
    %1 = vector.load %arg2[%c0_1, %c0_2] : memref<8x256xf32, #tpu.memory_space<vmem>>, vector<8x256xf32>
    %cst = arith.constant dense<0.000000e+00> : vector<128x256xf32>
    %2 = tpu.matmul %0, %1, %cst {dimension_numbers = #tpu.dot_dimension_numbers<[1], [0], [0], [1], [0, 0, 1, 1], [], []>} : vector<128x8xf32>, vector<8x256xf32>, vector<128x256xf32> -> vector<128x256xf32>
    %c0_3 = arith.constant 0 : index
    %c0_4 = arith.constant 0 : index
    %3 = vector.load %arg3[%c0_3, %c0_4] : memref<1x256xf32, #tpu.memory_space<vmem>>, vector<1x256xf32>
    %4 = vector.broadcast %3 : vector<1x256xf32> to vector<128x256xf32>
    %5 = arith.addf %2, %4 : vector<128x256xf32>
    %cst_5 = arith.constant 0.000000e+00 : f32
    %6 = vector.broadcast %cst_5 : f32 to vector<128x256xf32>
    %7 = arith.maximumf %5, %6 : vector<128x256xf32>
    %c0_6 = arith.constant 0 : index
    %c0_7 = arith.constant 0 : index
    %8 = vector.load %arg4[%c0_6, %c0_7] : memref<256x256xf32, #tpu.memory_space<vmem>>, vector<256x256xf32>
    %cst_8 = arith.constant dense<0.000000e+00> : vector<128x256xf32>
    %9 = tpu.matmul %7, %8, %cst_8 {dimension_numbers = #tpu.dot_dimension_numbers<[1], [0], [0], [1], [0, 0, 1, 1], [], []>} : vector<128x256xf32>, vector<256x256xf32>, vector<128x256xf32> -> vector<128x256xf32>
    %c0_9 = arith.constant 0 : index
    %c0_10 = arith.constant 0 : index
    %10 = vector.load %arg5[%c0_9, %c0_10] : memref<1x256xf32, #tpu.memory_space<vmem>>, vector<1x256xf32>
    %11 = vector.broadcast %10 : vector<1x256xf32> to vector<128x256xf32>
    %12 = arith.addf %9, %11 : vector<128x256xf32>
    %cst_11 = arith.constant 0.000000e+00 : f32
    %13 = vector.broadcast %cst_11 : f32 to vector<128x256xf32>
    %14 = arith.maximumf %12, %13 : vector<128x256xf32>
    %c0_12 = arith.constant 0 : index
    %c0_13 = arith.constant 0 : index
    %15 = vector.load %arg6[%c0_12, %c0_13] : memref<8x256xf32, #tpu.memory_space<vmem>>, vector<8x256xf32>
    %cst_14 = arith.constant dense<0.000000e+00> : vector<8x128xf32>
    %16 = tpu.matmul %15, %14, %cst_14 {dimension_numbers = #tpu.dot_dimension_numbers<[1], [1], [0], [0], [0, 0, 1, 0], [], []>} : vector<8x256xf32>, vector<128x256xf32>, vector<8x128xf32> -> vector<8x128xf32>
    %17 = vector.extract_strided_slice %16 {offsets = [0, 0], sizes = [1, 128], strides = [1, 1]} : vector<8x128xf32> to vector<1x128xf32>
    %c0_15 = arith.constant 0 : index
    %18 = memref.load %arg7[%c0_15] : memref<1xf32, #tpu.memory_space<smem>>
    %19 = vector.broadcast %18 : f32 to vector<1x128xf32>
    %20 = arith.addf %17, %19 : vector<1x128xf32>
    %cst_16 = arith.constant 0.000000e+00 : f32
    %21 = vector.broadcast %cst_16 : f32 to vector<1x128xf32>
    %22 = arith.subf %21, %20 : vector<1x128xf32>
    %23 = math.exp %22 : vector<1x128xf32>
    %cst_17 = arith.constant 1.000000e+00 : f32
    %24 = vector.broadcast %cst_17 : f32 to vector<1x128xf32>
    %25 = arith.addf %24, %23 : vector<1x128xf32>
    %26 = tpu.reciprocal %25 : vector<1x128xf32> -> vector<1x128xf32>
    %27 = vector.shape_cast %26 : vector<1x128xf32> to vector<1x1x128xf32>
    %c0_18 = arith.constant 0 : index
    %c0_19 = arith.constant 0 : index
    %c0_20 = arith.constant 0 : index
    %28 = vector.load %arg8[%c0_18, %c0_19, %c0_20] : memref<1x1x128xf32, #tpu.memory_space<vmem>>, vector<1x1x128xf32>
    tpu.vector_store %arg8[%c0_18, %c0_19, %c0_20], %27 {strides = array<i32>} : memref<1x1x128xf32, #tpu.memory_space<vmem>>, vector<1x1x128xf32>,
    return
  }
  func.func @transform_0(%arg0: i32) -> (i32, i32) {
    %c0_i32 = arith.constant 0 : i32
    %c0_i32_0 = arith.constant 0 : i32
    return %arg0, %c0_i32 : i32, i32
  }
  func.func @transform_1(%arg0: i32) -> (i32, i32) {
    %c0_i32 = arith.constant 0 : i32
    %c0_i32_0 = arith.constant 0 : i32
    %c0_i32_1 = arith.constant 0 : i32
    return %c0_i32, %c0_i32_0 : i32, i32
  }
  func.func @transform_2(%arg0: i32) -> (i32, i32) {
    %c0_i32 = arith.constant 0 : i32
    %c0_i32_0 = arith.constant 0 : i32
    %c0_i32_1 = arith.constant 0 : i32
    return %c0_i32, %c0_i32_0 : i32, i32
  }
  func.func @transform_3(%arg0: i32) -> (i32, i32) {
    %c0_i32 = arith.constant 0 : i32
    %c0_i32_0 = arith.constant 0 : i32
    %c0_i32_1 = arith.constant 0 : i32
    return %c0_i32, %c0_i32_0 : i32, i32
  }
  func.func @transform_4(%arg0: i32) -> (i32, i32) {
    %c0_i32 = arith.constant 0 : i32
    %c0_i32_0 = arith.constant 0 : i32
    %c0_i32_1 = arith.constant 0 : i32
    return %c0_i32, %c0_i32_0 : i32, i32
  }
  func.func @transform_5(%arg0: i32) -> (i32, i32) {
    %c0_i32 = arith.constant 0 : i32
    %c0_i32_0 = arith.constant 0 : i32
    %c0_i32_1 = arith.constant 0 : i32
    return %c0_i32, %c0_i32_0 : i32, i32
  }
  func.func @transform_6(%arg0: i32) -> i32 {
    %c0_i32 = arith.constant 0 : i32
    %c0_i32_0 = arith.constant 0 : i32
    return %c0_i32 : i32
  }
  func.func @transform_7(%arg0: i32) -> (i32, i32, i32) {
    %c0_i32 = arith.constant 0 : i32
    %c0_i32_0 = arith.constant 0 : i32
    %c0_i32_1 = arith.constant 0 : i32
    return %arg0, %c0_i32, %c0_i32_0 : i32, i32, i32
  }
}

</mosaic_0001>

<bundles_post_ra>
// kernel: tpu_custom_call.1
= control target key start
LH: loop header
LB: loop body
LE: loop exit
PB: predicated region body
PF: predicated region fallthrough
CT: control target
= control target key end

     0   :  { %13 = vsyncpa [#allocation4], 0  ;;  %s1032_s0 = inlined_call_operand.vmem [shape: f32[128,8], index: 0, kind: input, shape index: {}]   ;;  %s1033_s1 = inlined_call_operand.vmem [shape: f32[8,256], index: 1, kind: input, shape index: {}]   ;;  %s1034_s2 = inlined_call_operand.vmem [shape: f32[1,256], index: 2, kind: input, shape index: {}]   ;;  %s1035_s3 = inlined_call_operand.hbm [shape: f32[256,256], index: 3, kind: input, shape index: {}]   ;;  %s1036_s4 = inlined_call_operand.vmem [shape: f32[1,256], index: 4, kind: input, shape index: {}]   ;;  %s1037_s5 = inlined_call_operand.vmem [shape: f32[8,256], index: 5, kind: input, shape index: {}]   ;;  %s1038_s6 = inlined_call_operand.<no memory space> [shape: f32[1], index: 6, kind: input, shape index: {}]   ;;  %s1039_s7 = inlined_call_operand.hbm [shape: f32[1,1,128], index: 7, kind: output, shape index: {}]  }
   0x1   :  { %14 = vsyncpa [#allocation5], 0  ;;  %s748_s24 = smov [#allocation3]  }
   0x2   :  { %s26_s25 = sshll.u32 %s748_s24, 4  ;;  %s27_s25 = int_to_ptr.vmem [resolvable:$true] %s26_s25 }
   0x3   :  { %s712_s26 = scalar_lea.vmem %s27_s25, 8192  ;;  %p717_p1 = scmp.lt.s32.totalorder %s27_s25, %s27_s25 }
   0x4   :  { %p713_p0 = scmp.ne.s32.totalorder %s27_s25, %s712_s26  ;;  %p718_p2 = scmp.lt.s32.totalorder %s712_s26, %s712_s26 }
   0x6   :  { %p719_p3 = por %p718_p2, %p717_p1 }
   0x8   :  { %p720_p4 = pnand %p719_p3, %p713_p0 }
   0xa   :  { %723 = shalt.err (!%p720_p4)
}
   0xb   :  { %s749_s27 = smov 256   ;;  %s750_s28 = smov 16  }
   0xc   :  { %32 = dma.hbm_to_vmem [thread:$0]  %s1035_s3, 8192, %s27_s25, [#allocation4], %s749_s27, %s749_s27, %s750_s28  }
   0xd   :  { %744 = dma.done.wait [#allocation4], 8192  }
   0xe   :  { %745 = vsyncadd [#allocation4], 4294959104  ;;  %v751_v0 = vmov 0.0   ;;  %v59_v1 = vld [vmem:[%s1033_s1 + $0x8] sm:$0xff]  ;;  %v58_v2 = vld [vmem:[%s1033_s1] sm:$0xff]  ;;  %vm72_vm0 = vcmask 64512  }
   0xf   :  { %185 = vmatprep.mubr.f32.mxu0 %v751_v0  ;;  %v42_v3 = vld [vmem:[%s1032_s0] sm:$0xff]  ;;  %151 = vmatprep.subr.mxu0 %v59_v1  ;;  %v43_v4 = vld [vmem:[%s1032_s0 + $0x8] sm:$0xff]  ;;  %v345_v5 = vld [vmem:[#allocation3 + $0xf8] sm:$0xff]  ;;  %s752_s24 = smov [#allocation6]  }
  0x10   :  { %152 = vmatpush1.msra.mxu0 %v58_v2  ;;  %v344_v6 = vld [vmem:[#allocation3 + $0xf0] sm:$0xff]  ;;  %v343_v7 = vld [vmem:[#allocation3 + $0xe8] sm:$0xff]  ;;  %390 = vmatprep.subr.mxu1 %v345_v5  ;;  %v342_v8 = vld [vmem:[#allocation3 + $0xe0] sm:$0xff]  ;;  %s670_s25 = sshll.u32 %s752_s24, 4  ;;  %s671_s25 = int_to_ptr.vmem [resolvable:$true] %s670_s25 }
  0x11   :  { %679 = vmatmul.mubr.msk.f32.vlgmr.msra.gmra.mxu0 %vm72_vm0, %v42_v3  ;;  %v44_v9 = vld [vmem:[%s1032_s0 + $0x10] sm:$0xff]  ;;  %391 = vmatpush1.msra.mxu1 %v344_v6  ;;  %v341_v10 = vld [vmem:[#allocation3 + $0xd8] sm:$0xff]  ;;  %v339_v12 = vld [vmem:[#allocation3 + $0xc8] sm:$0xff]  ;;  %s728_s26 = scalar_lea.vmem %s671_s25, 32  ;;  %p729_p6 = scmp.lt.s32.totalorder %s671_s25, %s671_s25 }
  0x12   :  { %191 = vmatprep.mubr.f32.mxu0 %v751_v0  ;;  %392 = vmatprep.subr.mxu1 %v343_v7  ;;  %v340_v11 = vld [vmem:[#allocation3 + $0xd0] sm:$0xff]  ;;  %v338_v13 = vld [vmem:[#allocation3 + $0xc0] sm:$0xff]  ;;  %v45_v14 = vld [vmem:[%s1032_s0 + $0x18] sm:$0xff] }
  0x13   :  { %393 = vmatpush1.msra.mxu1 %v342_v8  ;;  %v337_v15 = vld [vmem:[#allocation3 + $0xb8] sm:$0xff]  ;;  %v336_v16 = vld [vmem:[#allocation3 + $0xb0] sm:$0xff]  ;;  %v335_v17 = vld [vmem:[#allocation3 + $0xa8] sm:$0xff] }
  0x14   :  { %394 = vmatprep.subr.mxu1 %v341_v10  ;;  %v334_v18 = vld [vmem:[#allocation3 + $0xa0] sm:$0xff]  ;;  %v333_v20 = vld [vmem:[#allocation3 + $0x98] sm:$0xff]  ;;  %v332_v21 = vld [vmem:[#allocation3 + $0x90] sm:$0xff] }
  0x15   :  { %680 = vmatmul.mubr.msk.f32.gmra.mxu0 %vm72_vm0, %v43_v4  ;;  %395 = vmatpush1.msra.mxu1 %v340_v11  ;;  %v46_v19 = vld [vmem:[%s1032_s0 + $0x20] sm:$0xff]  ;;  %v331_v22 = vld [vmem:[#allocation3 + $0x88] sm:$0xff]  ;;  %v329_v25 = vld [vmem:[#allocation3 + $0x78] sm:$0xff] }
  0x16   :  { %197 = vmatprep.mubr.f32.mxu0 %v751_v0  ;;  %396 = vmatprep.subr.mxu1 %v339_v12  ;;  %v330_v23 = vld [vmem:[#allocation3 + $0x80] sm:$0xff]  ;;  %v47_v24 = vld [vmem:[%s1032_s0 + $0x28] sm:$0xff]  ;;  %v328_v26 = vld [vmem:[#allocation3 + $0x70] sm:$0xff] }
  0x17   :  { %397 = vmatpush1.msra.mxu1 %v338_v13  ;;  %v327_v27 = vld [vmem:[#allocation3 + $0x68] sm:$0xff]  ;;  %v326_v28 = vld [vmem:[#allocation3 + $0x60] sm:$0xff]  ;;  %v48_v29 = vld [vmem:[%s1032_s0 + $0x30] sm:$0xff] }
  0x18   :  { %398 = vmatprep.subr.mxu1 %v337_v15  ;;  %v325_v30 = vld [vmem:[#allocation3 + $0x58] sm:$0xff]  ;;  %v324_v31 = vld [vmem:[#allocation3 + $0x50] sm:$0xff]  ;;  %v323_v32 = vld [vmem:[#allocation3 + $0x48] sm:$0xff] }
  0x19   :  { %681 = vmatmul.mubr.msk.f32.gmra.mxu0 %vm72_vm0, %v44_v9  ;;  %399 = vmatpush1.msra.mxu1 %v336_v16  ;;  %v322_v33 = vld [vmem:[#allocation3 + $0x40] sm:$0xff]  ;;  %v49_v34 = vld [vmem:[%s1032_s0 + $0x38] sm:$0xff]  ;;  %v320_v36 = vld [vmem:[#allocation3 + $0x30] sm:$0xff] }
  0x1a   :  { %203 = vmatprep.mubr.f32.mxu0 %v751_v0  ;;  %400 = vmatprep.subr.mxu1 %v335_v17  ;;  %v321_v35 = vld [vmem:[#allocation3 + $0x38] sm:$0xff]  ;;  %v319_v37 = vld [vmem:[#allocation3 + $0x28] sm:$0xff]  ;;  %v318_v38 = vld [vmem:[#allocation3 + $0x20] sm:$0xff] }
  0x1b   :  { %401 = vmatpush1.msra.mxu1 %v334_v18  ;;  %v50_v39 = vld [vmem:[%s1032_s0 + $0x40] sm:$0xff]  ;;  %v317_v40 = vld [vmem:[#allocation3 + $0x18] sm:$0xff]  ;;  %v316_v41 = vld [vmem:[#allocation3 + $0x10] sm:$0xff] }
  0x1c   :  { %402 = vmatprep.subr.mxu1 %v333_v20  ;;  %v315_v42 = vld [vmem:[#allocation3 + $0x8] sm:$0xff]  ;;  %v314_v43 = vld [vmem:[#allocation3] sm:$0xff]  ;;  %v377_v45 = vld [vmem:[#allocation3 + $0x1f8] sm:$0xff] }
  0x1d   :  { %682 = vmatmul.mubr.msk.f32.gmra.mxu0 %vm72_vm0, %v45_v14  ;;  %403 = vmatpush1.msra.mxu1 %v332_v21  ;;  %v51_v44 = vld [vmem:[%s1032_s0 + $0x48] sm:$0xff]  ;;  %v376_v46 = vld [vmem:[#allocation3 + $0x1f0] sm:$0xff]  ;;  %v374_v48 = vld [vmem:[#allocation3 + $0x1e0] sm:$0xff] }
  0x1e   :  { %209 = vmatprep.mubr.f32.mxu0 %v751_v0  ;;  %404 = vmatprep.subr.mxu1 %v331_v22  ;;  %v375_v47 = vld [vmem:[#allocation3 + $0x1e8] sm:$0xff]  ;;  %v52_v49 = vld [vmem:[%s1032_s0 + $0x50] sm:$0xff]  ;;  %v373_v50 = vld [vmem:[#allocation3 + $0x1d8] sm:$0xff] }
  0x1f   :  { %405 = vmatpush1.msra.mxu1 %v330_v23  ;;  %v372_v51 = vld [vmem:[#allocation3 + $0x1d0] sm:$0xff]  ;;  %v371_v52 = vld [vmem:[#allocation3 + $0x1c8] sm:$0xff]  ;;  %v370_v53 = vld [vmem:[#allocation3 + $0x1c0] sm:$0xff] }
  0x20   :  { %406 = vmatprep.subr.mxu1 %v329_v25  ;;  %v53_v54 = vld [vmem:[%s1032_s0 + $0x58] sm:$0xff]  ;;  %v368_v56 = vld [vmem:[#allocation3 + $0x1b0] sm:$0xff]  ;;  %v367_v57 = vld [vmem:[#allocation3 + $0x1a8] sm:$0xff] }
  0x21   :  { %683 = vmatmul.mubr.msk.f32.gmra.mxu0 %vm72_vm0, %v46_v19  ;;  %407 = vmatpush1.msra.mxu1 %v328_v26  ;;  %v369_v55 = vld [vmem:[#allocation3 + $0x1b8] sm:$0xff]  ;;  %v366_v58 = vld [vmem:[#allocation3 + $0x1a0] sm:$0xff]  ;;  %v364_v61 = vld [vmem:[#allocation3 + $0x190] sm:$0xff]  ;;  %v62_v19 = vlaneseq }
  0x22   :  { %215 = vmatprep.mubr.f32.mxu0 %v751_v0  ;;  %408 = vmatprep.subr.mxu1 %v327_v27  ;;  %v54_v59 = vld [vmem:[%s1032_s0 + $0x60] sm:$0xff]  ;;  %v365_v60 = vld [vmem:[#allocation3 + $0x198] sm:$0xff]  ;;  %v363_v62 = vld [vmem:[#allocation3 + $0x188] sm:$0xff] }
  0x23   :  { %409 = vmatpush1.msra.mxu1 %v326_v28  ;;  %v362_v63 = vld [vmem:[#allocation3 + $0x180] sm:$0xff]  ;;  %v55_v1 = vld [vmem:[%s1032_s0 + $0x68] sm:$0xff]  ;;  %v361_v2 = vld [vmem:[#allocation3 + $0x178] sm:$0xff]  ;;  %v882_v20 = vshrl.u32 %v62_v19, 7 }
  0x24   :  { %410 = vmatprep.subr.mxu1 %v325_v30  ;;  %v360_v3 = vld [vmem:[#allocation3 + $0x170] sm:$0xff]  ;;  %v359_v4 = vld [vmem:[#allocation3 + $0x168] sm:$0xff]  ;;  %v358_v5 = vld [vmem:[#allocation3 + $0x160] sm:$0xff] }
  0x25   :  { %684 = vmatmul.mubr.msk.f32.gmra.mxu0 %vm72_vm0, %v47_v24  ;;  %411 = vmatpush1.msra.mxu1 %v324_v31  ;;  %v56_v6 = vld [vmem:[%s1032_s0 + $0x70] sm:$0xff]  ;;  %v357_v7 = vld [vmem:[#allocation3 + $0x158] sm:$0xff]  ;;  %v355_v9 = vld [vmem:[#allocation3 + $0x148] sm:$0xff]  ;;  %v64_v21 = vsub.s32 0, %v882_v20  ;;  %v68_v23 = vsub.s32 1, %v882_v20 }
  0x26   :  { %221 = vmatprep.mubr.f32.mxu0 %v751_v0  ;;  %412 = vmatprep.subr.mxu1 %v323_v32  ;;  %v356_v8 = vld [vmem:[#allocation3 + $0x150] sm:$0xff]  ;;  %v354_v10 = vld [vmem:[#allocation3 + $0x140] sm:$0xff]  ;;  %v57_v11 = vld [vmem:[%s1032_s0 + $0x78] sm:$0xff] }
  0x27   :  { %413 = vmatpush1.msra.mxu1 %v322_v33  ;;  %v353_v12 = vld [vmem:[#allocation3 + $0x138] sm:$0xff]  ;;  %v352_v13 = vld [vmem:[#allocation3 + $0x130] sm:$0xff]  ;;  %v351_v14 = vld [vmem:[#allocation3 + $0x128] sm:$0xff] }
  0x28   :  { %414 = vmatprep.subr.mxu1 %v321_v35  ;;  %v350_v15 = vld [vmem:[#allocation3 + $0x120] sm:$0xff]  ;;  %v349_v16 = vld [vmem:[#allocation3 + $0x118] sm:$0xff]  ;;  %v347_v17 = vld [vmem:[#allocation3 + $0x108] sm:$0xff] }
  0x29   :  { %685 = vmatmul.mubr.msk.f32.gmra.mxu0 %vm72_vm0, %v48_v29  ;;  %415 = vmatpush1.msra.mxu1 %v320_v36  ;;  %v346_v18 = vld [vmem:[#allocation3 + $0x100] sm:$0xff] }
  0x2a   :  { %227 = vmatprep.mubr.f32.mxu0 %v751_v0  ;;  %416 = vmatprep.subr.mxu1 %v319_v37  ;;  %v60_v22 = vld [vmem:[%s1034_s2] sm:$0x3] }
  0x2b   :  { %417 = vmatpush1.msra.mxu1 %v318_v38  ;;  %v891_v24 = vrot.slane %v60_v22, %v64_v21  ;;  %v895_v25 = vrot.slane %v60_v22, %v68_v23 }
  0x2c   :  { %418 = vmatprep.subr.mxu1 %v317_v40 }
  0x2d   :  { %686 = vmatmul.mubr.msk.f32.gmra.mxu0 %vm72_vm0, %v49_v34  ;;  %419 = vmatpush1.msra.mxu1 %v316_v41 }
  0x2e   :  { %233 = vmatprep.mubr.f32.mxu0 %v751_v0  ;;  %420 = vmatprep.subr.mxu1 %v315_v42 }
  0x2f   :  { %421 = vmatpush1.msra.mxu1 %v314_v43 }
  0x30   :  { %422 = vmatprep.subr.mxu1 %v377_v45 }
  0x31   :  { %687 = vmatmul.mubr.msk.f32.gmra.mxu0 %vm72_vm0, %v50_v39  ;;  %423 = vmatpush2.msra.mxu1 %v376_v46 }
  0x32   :  { %239 = vmatprep.mubr.f32.mxu0 %v751_v0  ;;  %424 = vmatprep.subr.mxu1 %v375_v47 }
  0x33   :  { %425 = vmatpush2.msra.mxu1 %v374_v48 }
  0x34   :  { %426 = vmatprep.subr.mxu1 %v373_v50 }
  0x35   :  { %688 = vmatmul.mubr.msk.f32.gmra.mxu0 %vm72_vm0, %v51_v44  ;;  %427 = vmatpush2.msra.mxu1 %v372_v51 }
  0x36   :  { %245 = vmatprep.mubr.f32.mxu0 %v751_v0  ;;  %428 = vmatprep.subr.mxu1 %v371_v52 }
  0x37   :  { %429 = vmatpush2.msra.mxu1 %v370_v53 }
  0x38   :  { %430 = vmatprep.subr.mxu1 %v369_v55 }
  0x39   :  { %689 = vmatmul.mubr.msk.f32.gmra.mxu0 %vm72_vm0, %v52_v49  ;;  %431 = vmatpush2.msra.mxu1 %v368_v56 }
  0x3a   :  { %251 = vmatprep.mubr.f32.mxu0 %v751_v0  ;;  %432 = vmatprep.subr.mxu1 %v367_v57 }
  0x3b   :  { %433 = vmatpush2.msra.mxu1 %v366_v58 }
  0x3c   :  { %434 = vmatprep.subr.mxu1 %v365_v60 }
  0x3d   :  { %690 = vmatmul.mubr.msk.f32.gmra.mxu0 %vm72_vm0, %v53_v54  ;;  %435 = vmatpush2.msra.mxu1 %v364_v61 }
  0x3e   :  { %257 = vmatprep.mubr.f32.mxu0 %v751_v0  ;;  %436 = vmatprep.subr.mxu1 %v363_v62 }
  0x3f   :  { %437 = vmatpush2.msra.mxu1 %v362_v63 }
  0x40   :  { %438 = vmatprep.subr.mxu1 %v361_v2 }
  0x41   :  { %691 = vmatmul.mubr.msk.f32.gmra.mxu0 %vm72_vm0, %v54_v59  ;;  %439 = vmatpush2.msra.mxu1 %v360_v3 }
  0x42   :  { %263 = vmatprep.mubr.f32.mxu0 %v751_v0  ;;  %440 = vmatprep.subr.mxu1 %v359_v4 }
  0x43   :  { %441 = vmatpush2.msra.mxu1 %v358_v5 }
  0x44   :  { %442 = vmatprep.subr.mxu1 %v357_v7 }
  0x45   :  { %692 = vmatmul.mubr.msk.f32.gmra.mxu0 %vm72_vm0, %v55_v1  ;;  %443 = vmatpush2.msra.mxu1 %v356_v8 }
  0x46   :  { %269 = vmatprep.mubr.f32.mxu0 %v751_v0  ;;  %444 = vmatprep.subr.mxu1 %v355_v9 }
  0x47   :  { %445 = vmatpush2.msra.mxu1 %v354_v10 }
  0x48   :  { %446 = vmatprep.subr.mxu1 %v353_v12 }
  0x49   :  { %693 = vmatmul.mubr.msk.f32.gmra.mxu0 %vm72_vm0, %v56_v6  ;;  %447 = vmatpush2.msra.mxu1 %v352_v13 }
  0x4a   :  { %275 = vmatprep.mubr.f32.mxu0 %v751_v0  ;;  %448 = vmatprep.subr.mxu1 %v351_v14  ;;  %v348_v0 = vld [vmem:[#allocation3 + $0x110] sm:$0xff] }
  0x4b   :  { %449 = vmatpush2.msra.mxu1 %v350_v15 }
  0x4c   :  { %450 = vmatprep.subr.mxu1 %v349_v16 }
  0x4d   :  { %694 = vmatmul.mubr.msk.f32.gmra.mxu0 %vm72_vm0, %v57_v11  ;;  %451 = vmatpush2.msra.mxu1 %v348_v0 }
  0x4e   :  { %452 = vmatprep.subr.mxu1 %v347_v17 }
  0x4f   :  { %453 = vmatpush2.msra.mxu1 %v346_v18 }
  0xd1   :  { %v187_v26 = vpop.f32.mrf.mxu0 }
  0xd2   :  { %v188_v27 = vadd.f32 %v187_v26, %v891_v24 }
  0xd3   :  { %v189_v28 = vpop.f32.mrf.mxu0 }
  0xd4   :  { %v190_v29 = vadd.f32 %v189_v28, %v895_v25  ;;  %v282_v32 = vmax.f32 %v188_v27, 0.0 }
  0xd5   :  { %v193_v30 = vpop.f32.mrf.mxu0 }
  0xd6   :  { %v283_v31 = vmax.f32 %v190_v29, 0.0  ;;  %v194_v33 = vadd.f32 %v193_v30, %v891_v24 }
  0xd7   :  { %v195_v34 = vpop.f32.mrf.mxu0 }
  0xd8   :  { %v196_v35 = vadd.f32 %v195_v34, %v895_v25  ;;  %454 = vmatprep.mubr.f32.mxu1 %v283_v31  ;;  %v284_v38 = vmax.f32 %v194_v33, 0.0 }
  0xd9   :  { %v199_v36 = vpop.f32.mrf.mxu0  ;;  %455 = vmatmul.mubr.f32.vlgmr.msra.gmra.mxu1 %v282_v32 }
  0xda   :  { %v285_v37 = vmax.f32 %v196_v35, 0.0  ;;  %v200_v39 = vadd.f32 %v199_v36, %v891_v24 }
  0xdb   :  { %v201_v40 = vpop.f32.mrf.mxu0 }
  0xdc   :  { %v202_v41 = vadd.f32 %v201_v40, %v895_v25  ;;  %460 = vmatprep.mubr.f32.mxu1 %v285_v37  ;;  %v286_v44 = vmax.f32 %v200_v39, 0.0 }
  0xdd   :  { %v205_v42 = vpop.f32.mrf.mxu0  ;;  %461 = vmatmul.mubr.f32.gmra.mxu1 %v284_v38 }
  0xde   :  { %v287_v43 = vmax.f32 %v202_v41, 0.0  ;;  %v206_v45 = vadd.f32 %v205_v42, %v891_v24 }
  0xdf   :  { %v207_v46 = vpop.f32.mrf.mxu0 }
  0xe0   :  { %v208_v47 = vadd.f32 %v207_v46, %v895_v25  ;;  %466 = vmatprep.mubr.f32.mxu1 %v287_v43  ;;  %v288_v50 = vmax.f32 %v206_v45, 0.0 }
  0xe1   :  { %v211_v48 = vpop.f32.mrf.mxu0  ;;  %467 = vmatmul.mubr.f32.gmra.mxu1 %v286_v44 }
  0xe2   :  { %v289_v49 = vmax.f32 %v208_v47, 0.0  ;;  %v212_v51 = vadd.f32 %v211_v48, %v891_v24 }
  0xe3   :  { %v213_v52 = vpop.f32.mrf.mxu0 }
  0xe4   :  { %v214_v53 = vadd.f32 %v213_v52, %v895_v25  ;;  %472 = vmatprep.mubr.f32.mxu1 %v289_v49  ;;  %v290_v56 = vmax.f32 %v212_v51, 0.0 }
  0xe5   :  { %v217_v54 = vpop.f32.mrf.mxu0  ;;  %473 = vmatmul.mubr.f32.gmra.mxu1 %v288_v50 }
  0xe6   :  { %v291_v55 = vmax.f32 %v214_v53, 0.0  ;;  %v218_v57 = vadd.f32 %v217_v54, %v891_v24 }
  0xe7   :  { %v219_v58 = vpop.f32.mrf.mxu0 }
  0xe8   :  { %v220_v59 = vadd.f32 %v219_v58, %v895_v25  ;;  %478 = vmatprep.mubr.f32.mxu1 %v291_v55  ;;  %v292_v62 = vmax.f32 %v218_v57, 0.0 }
  0xe9   :  { %v223_v60 = vpop.f32.mrf.mxu0  ;;  %479 = vmatmul.mubr.f32.gmra.mxu1 %v290_v56 }
  0xea   :  { %v293_v61 = vmax.f32 %v220_v59, 0.0  ;;  %v224_v63 = vadd.f32 %v223_v60, %v891_v24 }
  0xeb   :  { %v225_v1 = vpop.f32.mrf.mxu0 }
  0xec   :  { %v226_v2 = vadd.f32 %v225_v1, %v895_v25  ;;  %484 = vmatprep.mubr.f32.mxu1 %v293_v61  ;;  %v294_v5 = vmax.f32 %v224_v63, 0.0  ;;  %v584_v1 = vld [vmem:[%s1037_s5 + $0x8] sm:$0xff] }
  0xed   :  { %v229_v3 = vpop.f32.mrf.mxu0  ;;  %485 = vmatmul.mubr.f32.gmra.mxu1 %v292_v62  ;;  %649 = vmatprep.mubr.f32.mxu0 %v584_v1 }
  0xee   :  { %v295_v4 = vmax.f32 %v226_v2, 0.0  ;;  %v230_v6 = vadd.f32 %v229_v3, %v891_v24 }
  0xef   :  { %v231_v7 = vpop.f32.mrf.mxu0 }
  0xf0   :  { %v232_v8 = vadd.f32 %v231_v7, %v895_v25  ;;  %490 = vmatprep.mubr.f32.mxu1 %v295_v4  ;;  %v296_v11 = vmax.f32 %v230_v6, 0.0 }
  0xf1   :  { %v235_v9 = vpop.f32.mrf.mxu0  ;;  %491 = vmatmul.mubr.f32.gmra.mxu1 %v294_v5 }
  0xf2   :  { %v297_v10 = vmax.f32 %v232_v8, 0.0  ;;  %v236_v12 = vadd.f32 %v235_v9, %v891_v24 }
  0xf3   :  { %v237_v13 = vpop.f32.mrf.mxu0 }
  0xf4   :  { %v238_v14 = vadd.f32 %v237_v13, %v895_v25  ;;  %496 = vmatprep.mubr.f32.mxu1 %v297_v10  ;;  %v298_v0 = vmax.f32 %v236_v12, 0.0 }
  0xf5   :  { %v241_v15 = vpop.f32.mrf.mxu0  ;;  %497 = vmatmul.mubr.f32.gmra.mxu1 %v296_v11 }
  0xf6   :  { %v299_v16 = vmax.f32 %v238_v14, 0.0  ;;  %v242_v17 = vadd.f32 %v241_v15, %v891_v24 }
  0xf7   :  { %v243_v18 = vpop.f32.mrf.mxu0 }
  0xf8   :  { %v244_v19 = vadd.f32 %v243_v18, %v895_v25  ;;  %502 = vmatprep.mubr.f32.mxu1 %v299_v16  ;;  %v300_v27 = vmax.f32 %v242_v17, 0.0 }
  0xf9   :  { %v247_v22 = vpop.f32.mrf.mxu0  ;;  %503 = vmatmul.mubr.f32.gmra.mxu1 %v298_v0 }
  0xfa   :  { %v301_v26 = vmax.f32 %v244_v19, 0.0  ;;  %v248_v28 = vadd.f32 %v247_v22, %v891_v24 }
  0xfb   :  { %v249_v29 = vpop.f32.mrf.mxu0 }
  0xfc   :  { %v250_v30 = vadd.f32 %v249_v29, %v895_v25  ;;  %508 = vmatprep.mubr.f32.mxu1 %v301_v26  ;;  %v302_v33 = vmax.f32 %v248_v28, 0.0 }
  0xfd   :  { %v253_v31 = vpop.f32.mrf.mxu0  ;;  %509 = vmatmul.mubr.f32.gmra.mxu1 %v300_v27 }
  0xfe   :  { %v303_v32 = vmax.f32 %v250_v30, 0.0  ;;  %v254_v34 = vadd.f32 %v253_v31, %v891_v24 }
  0xff   :  { %v255_v35 = vpop.f32.mrf.mxu0 }
 0x100   :  { %v256_v36 = vadd.f32 %v255_v35, %v895_v25  ;;  %514 = vmatprep.mubr.f32.mxu1 %v303_v32  ;;  %v304_v39 = vmax.f32 %v254_v34, 0.0  ;;  %v378_v32 = vld [vmem:[%s1036_s4] sm:$0x3] }
 0x101   :  { %v259_v37 = vpop.f32.mrf.mxu0  ;;  %515 = vmatmul.mubr.f32.gmra.mxu1 %v302_v33  ;;  %v969_v34 = vrot.slane %v378_v32, %v64_v21 }
 0x102   :  { %v305_v38 = vmax.f32 %v256_v36, 0.0  ;;  %v260_v40 = vadd.f32 %v259_v37, %v891_v24  ;;  %v973_v36 = vrot.slane %v378_v32, %v68_v23 }
 0x103   :  { %v261_v41 = vpop.f32.mrf.mxu0 }
 0x104   :  { %v262_v42 = vadd.f32 %v261_v41, %v895_v25  ;;  %520 = vmatprep.mubr.f32.mxu1 %v305_v38  ;;  %v306_v45 = vmax.f32 %v260_v40, 0.0 }
 0x105   :  { %v265_v43 = vpop.f32.mrf.mxu0  ;;  %521 = vmatmul.mubr.f32.gmra.mxu1 %v304_v39 }
 0x106   :  { %v307_v44 = vmax.f32 %v262_v42, 0.0  ;;  %v266_v46 = vadd.f32 %v265_v43, %v891_v24 }
 0x107   :  { %v267_v47 = vpop.f32.mrf.mxu0 }
 0x108   :  { %v268_v48 = vadd.f32 %v267_v47, %v895_v25  ;;  %526 = vmatprep.mubr.f32.mxu1 %v307_v44  ;;  %v308_v51 = vmax.f32 %v266_v46, 0.0 }
 0x109   :  { %v271_v49 = vpop.f32.mrf.mxu0  ;;  %527 = vmatmul.mubr.f32.gmra.mxu1 %v306_v45 }
 0x10a   :  { %v309_v50 = vmax.f32 %v268_v48, 0.0  ;;  %v272_v52 = vadd.f32 %v271_v49, %v891_v24 }
 0x10b   :  { %v273_v53 = vpop.f32.mrf.mxu0 }
 0x10c   :  { %v274_v54 = vadd.f32 %v273_v53, %v895_v25  ;;  %532 = vmatprep.mubr.f32.mxu1 %v309_v50  ;;  %v310_v57 = vmax.f32 %v272_v52, 0.0 }
 0x10d   :  { %v277_v55 = vpop.f32.mrf.mxu0  ;;  %533 = vmatmul.mubr.f32.gmra.mxu1 %v308_v51 }
 0x10e   :  { %v311_v56 = vmax.f32 %v274_v54, 0.0  ;;  %v278_v58 = vadd.f32 %v277_v55, %v891_v24 }
 0x10f   :  { %v279_v59 = vpop.f32.mrf.mxu0 }
 0x110   :  { %v280_v60 = vadd.f32 %v279_v59, %v895_v25  ;;  %538 = vmatprep.mubr.f32.mxu1 %v311_v56  ;;  %v312_v62 = vmax.f32 %v278_v58, 0.0 }
 0x111   :  { %539 = vmatmul.mubr.f32.gmra.mxu1 %v310_v57 }
 0x112   :  { %v313_v61 = vmax.f32 %v280_v60, 0.0 }
 0x114   :  { %544 = vmatprep.mubr.f32.mxu1 %v313_v61 }
 0x115   :  { %545 = vmatmul.mubr.f32.gmra.mxu1 %v312_v62 }
 0x199   :  { %v929_v63 = vpop.f32.mrf.mxu1 }
 0x19b   :  { %v934_v2 = vpop.f32.mrf.mxu1 }
 0x19d   :  { %v936_v3 = vpop.f32.mrf.mxu1 }
 0x19f   :  { %v938_v24 = vpop.f32.mrf.mxu1 }
 0x1a1   :  { %v940_v25 = vpop.f32.mrf.mxu1 }
 0x1a3   :  { %v942_v4 = vpop.f32.mrf.mxu1 }
 0x1a5   :  { %v944_v5 = vpop.f32.mrf.mxu1 }
 0x1a7   :  { %v946_v6 = vpop.f32.mrf.mxu1 }
 0x1a9   :  { %v948_v7 = vpop.f32.mrf.mxu1 }
 0x1ab   :  { %v950_v8 = vpop.f32.mrf.mxu1 }
 0x1ad   :  { %v952_v9 = vpop.f32.mrf.mxu1 }
 0x1af   :  { %v954_v10 = vpop.f32.mrf.mxu1 }
 0x1b1   :  { %v956_v11 = vpop.f32.mrf.mxu1 }
 0x1b3   :  { %v958_v12 = vpop.f32.mrf.mxu1 }
 0x1b5   :  { %v960_v13 = vpop.f32.mrf.mxu1 }
 0x1b7   :  { %v962_v14 = vpop.f32.mrf.mxu1 }
 0x1b9   :  { %v504_v15 = vpop.f32.mrf.mxu1 }
 0x1ba   :  { %v505_v1 = vadd.f32 %v504_v15, %v969_v34  ;;  %v493_v15 = vadd.f32 %v956_v11, %v969_v34  ;;  %v481_v11 = vadd.f32 %v948_v7, %v969_v34  ;;  %v469_v7 = vadd.f32 %v940_v25, %v969_v34 }
 0x1bb   :  { %v506_v16 = vpop.f32.mrf.mxu1  ;;  %v457_v25 = vadd.f32 %v929_v63, %v969_v34 }
 0x1bc   :  { %v507_v61 = vadd.f32 %v506_v16, %v973_v36 }
 0x1bd   :  { %v510_v0 = vpop.f32.mrf.mxu1 }
 0x1be   :  { %v511_v59 = vadd.f32 %v510_v0, %v969_v34  ;;  %v495_v0 = vadd.f32 %v958_v12, %v973_v36  ;;  %v483_v12 = vadd.f32 %v950_v8, %v973_v36  ;;  %v471_v8 = vadd.f32 %v942_v4, %v973_v36 }
 0x1bf   :  { %v512_v17 = vpop.f32.mrf.mxu1  ;;  %v459_v4 = vadd.f32 %v934_v2, %v973_v36  ;;  %v656_v2 = vstv %s1038_s6 }
 0x1c0   :  { %v513_v57 = vadd.f32 %v512_v17, %v973_v36  ;;  %v499_v17 = vadd.f32 %v960_v13, %v969_v34  ;;  %v487_v13 = vadd.f32 %v952_v9, %v969_v34  ;;  %v560_v32 = vmax.f32 %v483_v12, 0.0 }
 0x1c1   :  { %v516_v18 = vpop.f32.mrf.mxu1  ;;  %v475_v9 = vadd.f32 %v944_v5, %v969_v34  ;;  %v463_v5 = vadd.f32 %v936_v3, %v969_v34  ;;  %v583_v3 = vld [vmem:[%s1037_s5] sm:$0xff]  ;;  %s724_s5 = scalar_lea.vmem %s671_s25, 16 }
 0x1c2   :  { %v517_v55 = vadd.f32 %v516_v18, %v969_v34  ;;  %v570_v62 = vmax.f32 %v513_v57, 0.0  ;;  %v501_v18 = vadd.f32 %v962_v14, %v973_v36  ;;  %v489_v14 = vadd.f32 %v954_v10, %v973_v36  ;;  %p725_p5 = scmp.ne.s32.totalorder %s671_s25, %s724_s5  ;;  %p730_p7 = scmp.lt.s32.totalorder %s728_s26, %s724_s5 }
 0x1c3   :  { %v518_v19 = vpop.f32.mrf.mxu1  ;;  %v477_v10 = vadd.f32 %v946_v6, %v973_v36  ;;  %v465_v6 = vadd.f32 %v938_v24, %v973_v36  ;;  %v551_v24 = vmax.f32 %v457_v25, 0.0 }
 0x1c4   :  { %v519_v53 = vadd.f32 %v518_v19, %v973_v36  ;;  %v571_v60 = vmax.f32 %v517_v55, 0.0  ;;  %v569_v19 = vmax.f32 %v511_v59, 0.0  ;;  %v566_v16 = vmax.f32 %v501_v18, 0.0  ;;  %p731_p8 = por %p730_p7, %p729_p6 }
 0x1c5   :  { %v522_v22 = vpop.f32.mrf.mxu1 }
 0x1c6   :  { %v523_v51 = vadd.f32 %v522_v22, %v969_v34  ;;  %v572_v58 = vmax.f32 %v519_v53, 0.0  ;;  %v568_v22 = vmax.f32 %v507_v61, 0.0  ;;  %p732_p9 = pnand %p731_p8, %p725_p5 }
 0x1c7   :  { %v524_v26 = vpop.f32.mrf.mxu1 }
 0x1c8   :  { %v525_v49 = vadd.f32 %v524_v26, %v973_v36  ;;  %v573_v56 = vmax.f32 %v523_v51, 0.0  ;;  %v567_v26 = vmax.f32 %v505_v1, 0.0 }
 0x1c9   :  { %v528_v27 = vpop.f32.mrf.mxu1 }
 0x1ca   :  { %v529_v47 = vadd.f32 %v528_v27, %v969_v34  ;;  %v574_v54 = vmax.f32 %v525_v49, 0.0  ;;  %v565_v27 = vmax.f32 %v499_v17, 0.0 }
 0x1cb   :  { %v530_v28 = vpop.f32.mrf.mxu1 }
 0x1cc   :  { %v531_v45 = vadd.f32 %v530_v28, %v973_v36  ;;  %v575_v52 = vmax.f32 %v529_v47, 0.0  ;;  %v564_v28 = vmax.f32 %v495_v0, 0.0 }
 0x1cd   :  { %v534_v29 = vpop.f32.mrf.mxu1 }
 0x1ce   :  { %v535_v20 = vadd.f32 %v534_v29, %v969_v34  ;;  %v576_v50 = vmax.f32 %v531_v45, 0.0  ;;  %v563_v29 = vmax.f32 %v493_v15, 0.0 }
 0x1cf   :  { %v536_v30 = vpop.f32.mrf.mxu1 }
 0x1d0   :  { %v537_v44 = vadd.f32 %v536_v30, %v973_v36  ;;  %v577_v48 = vmax.f32 %v535_v20, 0.0  ;;  %v562_v30 = vmax.f32 %v489_v14, 0.0 }
 0x1d1   :  { %v540_v31 = vpop.f32.mrf.mxu1 }
 0x1d2   :  { %v541_v42 = vadd.f32 %v540_v31, %v969_v34  ;;  %v578_v46 = vmax.f32 %v537_v44, 0.0  ;;  %v561_v31 = vmax.f32 %v487_v13, 0.0 }
 0x1d3   :  { %v542_v33 = vpop.f32.mrf.mxu1 }
 0x1d4   :  { %v543_v39 = vadd.f32 %v542_v33, %v973_v36  ;;  %v579_v23 = vmax.f32 %v541_v42, 0.0  ;;  %v559_v33 = vmax.f32 %v481_v11, 0.0  ;;  %v552_v42 = vmax.f32 %v459_v4, 0.0 }
 0x1d5   :  { %v546_v35 = vpop.f32.mrf.mxu1 }
 0x1d6   :  { %v547_v37 = vadd.f32 %v546_v35, %v969_v34  ;;  %v580_v21 = vmax.f32 %v543_v39, 0.0  ;;  %v558_v35 = vmax.f32 %v477_v10, 0.0  ;;  %v555_v39 = vmax.f32 %v469_v7, 0.0 }
 0x1d7   :  { %v548_v38 = vpop.f32.mrf.mxu1 }
 0x1d8   :  { %v549_v40 = vadd.f32 %v548_v38, %v973_v36  ;;  %v581_v43 = vmax.f32 %v547_v37, 0.0  ;;  %v557_v37 = vmax.f32 %v475_v9, 0.0  ;;  %v556_v38 = vmax.f32 %v471_v8, 0.0 }
 0x1da   :  { %v582_v41 = vmax.f32 %v549_v40, 0.0  ;;  %v554_v40 = vmax.f32 %v465_v6, 0.0 }
 0x1dc   :  { %585 = vmatprep.subr.mxu0 %v582_v41  ;;  %v553_v41 = vmax.f32 %v463_v5, 0.0 }
 0x1dd   :  { %586 = vmatpush1.xpose.msra.mxu0 %v581_v43 }
 0x1de   :  { %587 = vmatprep.subr.mxu0 %v580_v21 }
 0x1e1   :  { %588 = vmatpush1.xpose.msra.mxu0 %v579_v23 }
 0x1e2   :  { %589 = vmatprep.subr.mxu0 %v578_v46 }
 0x1e5   :  { %590 = vmatpush1.xpose.msra.mxu0 %v577_v48 }
 0x1e6   :  { %591 = vmatprep.subr.mxu0 %v576_v50 }
 0x1e9   :  { %592 = vmatpush1.xpose.msra.mxu0 %v575_v52 }
 0x1ea   :  { %593 = vmatprep.subr.mxu0 %v574_v54 }
 0x1ed   :  { %594 = vmatpush1.xpose.msra.mxu0 %v573_v56 }
 0x1ee   :  { %595 = vmatprep.subr.mxu0 %v572_v58 }
 0x1f1   :  { %596 = vmatpush1.xpose.msra.mxu0 %v571_v60 }
 0x1f2   :  { %597 = vmatprep.subr.mxu0 %v570_v62 }
 0x1f5   :  { %598 = vmatpush1.xpose.msra.mxu0 %v569_v19 }
 0x1f6   :  { %599 = vmatprep.subr.mxu0 %v568_v22 }
 0x1f9   :  { %600 = vmatpush1.xpose.msra.mxu0 %v567_v26 }
 0x1fa   :  { %601 = vmatprep.subr.mxu0 %v566_v16 }
 0x1fd   :  { %602 = vmatpush1.xpose.msra.mxu0 %v565_v27 }
 0x1fe   :  { %603 = vmatprep.subr.mxu0 %v564_v28 }
 0x201   :  { %604 = vmatpush1.xpose.msra.mxu0 %v563_v29 }
 0x202   :  { %605 = vmatprep.subr.mxu0 %v562_v30 }
 0x205   :  { %606 = vmatpush1.xpose.msra.mxu0 %v561_v31 }
 0x206   :  { %607 = vmatprep.subr.mxu0 %v560_v32 }
 0x209   :  { %608 = vmatpush1.xpose.msra.mxu0 %v559_v33 }
 0x20a   :  { %609 = vmatprep.subr.mxu0 %v558_v35 }
 0x20d   :  { %610 = vmatpush1.xpose.msra.mxu0 %v557_v37 }
 0x20e   :  { %611 = vmatprep.subr.mxu0 %v556_v38 }
 0x211   :  { %612 = vmatpush1.xpose.msra.mxu0 %v555_v39 }
 0x212   :  { %613 = vmatprep.subr.mxu0 %v554_v40 }
 0x215   :  { %614 = vmatpush1.xpose.msra.mxu0 %v553_v41 }
 0x216   :  { %615 = vmatprep.subr.mxu0 %v552_v42 }
 0x219   :  { %616 = vmatpush1.xpose.msra.mxu0 %v551_v24 }
 0x21c   :  { %650 = vmatmul.mubr.f32.vlgmr.msra.gmra.mxu0 %v583_v3 }
 0x2dc   :  { %v651_v36 = vpop.f32.mrf.mxu0 }
 0x2dd   :  { %v657_v43 = vadd.f32 %v656_v2, %v651_v36 }
 0x2de   :  { %v653_v44 = vpop.f32.mrf.mxu0 }
 0x2df   :  { %v658_v21 = vsub.f32 0.0, %v657_v43 }
 0x2e1   :  { %v659_v63 = vmul.f32 1.442695, %v658_v21 }
 0x2e3   :  { %700 = vpow2.f32 %v659_v63 }
 0x2f0   :  { %v701_v34 = vpop.eup %700 }
 0x2f1   :  { %v661_v20 = vadd.f32 1.0, %v701_v34 }
 0x2f3   :  { %702 = vrcp.f32 %v661_v20 }
 0x300   :  { %v703_v23 = vpop.eup %702 }
 0x301   :  { %663 = vst [vmem:[#allocation6] sm:$0x1] %v703_v23 }
 0x302   :  { %735 = shalt.err (!%p732_p9)
}
 0x303   :  { %673 = dma.vmem_to_hbm [thread:$0]  %s671_s25, 16, %s1039_s7, [#allocation5]  }
 0x304   :  { %746 = dma.done.wait [#allocation5], 16  }
 0x305   :  { %747 = vsyncadd [#allocation5], 4294967280 }
 0x306   :  { %677 = vsyncpa [#allocation4], 1 }
 0x307   :  { %678 = vsyncpa [#allocation5], 1 }

</bundles_post_ra>
